<compile_context>
chip_gen: v7x
topology: tpu7x:2x2x1
jax: 0.10.0
libtpu: 0.0.40
codegen_flags: <defaults>
</compile_context>

<pallas_src>
import jax
import jax.numpy as jnp
from jax.experimental import pallas as pl
from jax.experimental.pallas import tpu as pltpu

_MiB = 1024 * 1024


def _copy_kernel(x_ref, o_ref):
    # Input and output tiles have identical shapes: pure 1:1 copy, no slicing.
    o_ref[...] = x_ref[...]


def _round_up(v: int, m: int) -> int:
    return ((v + m - 1) // m) * m


def _vmem_capacity_bytes() -> int:
    """Best-effort VMEM capacity query; falls back to the v5e/v6e value."""
    try:
        return int(pltpu.get_tpu_info().vmem_capacity_bytes)
    except Exception:
        return 128 * _MiB  # conservative default: v5e/v6e-class part


def chomp1d(x: jax.Array, chomp_size: int, *, l_tile_max: int = 2048) -> jax.Array:
    """Equivalent of Chomp1d(chomp_size)(x) for x of shape (N, C, L)."""
    assert x.ndim == 3, "expected (N, C, L)"
    n, c, l = x.shape
    # PyTorch's x[:, :, :-0] is itself degenerate (empty); real TCN blocks use
    # chomp_size = (kernel_size - 1) * dilation > 0, so we require that here.
    assert 0 < chomp_size < l, "chomp_size must be in (0, L)"
    l_out = l - chomp_size

    rows = n * c
    x2 = x.reshape(rows, l)  # free reshape: NCL is row-major contiguous

    itemsize = jnp.dtype(x.dtype).itemsize
    # Sublane packing: 8 rows for 32-bit, 16 for bf16, 32 for int8/fp8.
    row_align = max(8, 32 // itemsize)

    # Generation-aware per-buffer tile target: bigger tiles on v7x where
    # 3.2 TB/s HBM makes the fixed per-step cost a large fraction of a 2 MiB
    # step; keep v5e/v6e at ~2 MiB (already >=85% of roofline there).
    vmem_cap = _vmem_capacity_bytes()
    if vmem_cap <= 96 * _MiB:      # v7x-class: 64 MiB VMEM per TensorCore
        target_tile_bytes = 8 * _MiB
    else:                          # v5e / v6e: 128 MiB VMEM
        target_tile_bytes = 2 * _MiB

    # L tile: (128-aligned) up to l_tile_max, clamped to the padded extent.
    l_tile = min(l_tile_max, _round_up(l_out, 128))

    # Row tile: keep the tile byte footprint ~constant when l_tile shrinks
    # (short TCN sequences), instead of letting tiles collapse to <512 KiB.
    r_tile = max(row_align, target_tile_bytes // (l_tile * itemsize))
    r_tile = _round_up(r_tile, row_align)
    r_tile = min(r_tile, _round_up(rows, row_align))

    # v7x has 2 TensorCores sharing the "parallel" grid: if everything landed
    # in a single block, split one axis so both cores drive DMA streams.
    # (No-op cost on single-TC v5e/v6e: one extra, fully pipelined grid step.)
    if pl.cdiv(rows, r_tile) * pl.cdiv(l_out, l_tile) < 2:
        if rows > row_align:
            r_tile = _round_up(pl.cdiv(rows, 2), row_align)
        elif l_out > 128:
            l_tile = _round_up(pl.cdiv(l_out, 2), 128)

    grid = (pl.cdiv(rows, r_tile), pl.cdiv(l_out, l_tile))

    # Explicit VMEM budget: 2x double-buffered in + out tiles plus headroom.
    # Capped at 48 MiB so we never approach v7x's 64 MiB physical VMEM; v5e
    # and v6e have 128 MiB physical, so this is always safe.
    tile_bytes = r_tile * l_tile * itemsize
    vmem_limit = int(min(48 * _MiB, max(32 * _MiB, 4 * tile_bytes + 8 * _MiB)))

    out2 = pl.pallas_call(
        _copy_kernel,
        out_shape=jax.ShapeDtypeStruct((rows, l_out), x.dtype),
        grid_spec=pl.GridSpec(
            grid=grid,
            # Same block shape + index_map for input and output: the input is
            # only read over the leading L_out columns (plus at most one
            # partially ragged block), so the chomped tail essentially never
            # leaves HBM.
            in_specs=[pl.BlockSpec((r_tile, l_tile), lambda ri, li: (ri, li))],
            out_specs=pl.BlockSpec((r_tile, l_tile), lambda ri, li: (ri, li)),
        ),
        compiler_params=pltpu.CompilerParams(
            dimension_semantics=("parallel", "parallel"),
            vmem_limit_bytes=vmem_limit,
        ),
        # Pure memory traffic: let XLA's scheduler overlap surrounding ops.
        cost_estimate=pl.CostEstimate(
            flops=0,
            transcendentals=0,
            bytes_accessed=2 * rows * l_out * itemsize,
        ),
    )(x2)

    return out2.reshape(n, c, l_out)


if __name__ == "__main__":
    key = jax.random.PRNGKey(0)
    # Small NCL input consistent with the TCN usage: batch=2, channels=4, length=16.
    N, C, L = 2, 4, 16
    chomp_size = 3  # e.g. (kernel_size - 1) * dilation from the TCN block

    x = jax.random.normal(key, (N, C, L), dtype=jnp.float32)
    out = jax.block_until_ready(chomp1d(x, chomp_size))

    ref = x[:, :, :-chomp_size]
    assert out.shape == (N, C, L - chomp_size), out.shape
    assert jnp.array_equal(out, ref), "mismatch vs reference slice (f32)"

    # Exercise the sub-32-bit row-alignment path (bf16 -> 16-row sublane packing).
    x_bf16 = x.astype(jnp.bfloat16)
    out_bf16 = jax.block_until_ready(chomp1d(x_bf16, chomp_size))
    assert jnp.array_equal(out_bf16, x_bf16[:, :, :-chomp_size]), "mismatch vs reference slice (bf16)"

    print("KERNEL_OK")
</pallas_src>

<mosaic_0001>
module attributes {stable_mosaic.version = 11 : i64} {
  func.func @_copy_kernel(%arg0: i32, %arg1: i32, %arg2: memref<8x128xf32, #tpu.memory_space<vmem>>, %arg3: memref<8x128xf32, #tpu.memory_space<vmem>>) attributes {dimension_semantics = [#tpu.dimension_semantics<parallel>, #tpu.dimension_semantics<parallel>], iteration_bounds = array<i64: 1, 1>, scalar_prefetch = 0 : i64, scratch_operands = 0 : i64, tpu.core_type = #tpu.core_type<tc>, window_params = [{transform_indices = @transform_0, window_bounds = array<i64: 8, 128>}, {transform_indices = @transform_1, window_bounds = array<i64: 8, 128>}]} {
    %c0 = arith.constant 0 : index
    %c0_0 = arith.constant 0 : index
    %0 = vector.load %arg2[%c0, %c0_0] : memref<8x128xf32, #tpu.memory_space<vmem>>, vector<8x128xf32>
    %c0_1 = arith.constant 0 : index
    %c0_2 = arith.constant 0 : index
    %1 = vector.load %arg3[%c0_1, %c0_2] : memref<8x128xf32, #tpu.memory_space<vmem>>, vector<8x128xf32>
    tpu.vector_store %arg3[%c0_1, %c0_2], %0 {strides = array<i32>} : memref<8x128xf32, #tpu.memory_space<vmem>>, vector<8x128xf32>,
    return
  }
  func.func @transform_0(%arg0: i32, %arg1: i32) -> (i32, i32) {
    %c0_i32 = arith.constant 0 : i32
    return %arg0, %arg1 : i32, i32
  }
  func.func @transform_1(%arg0: i32, %arg1: i32) -> (i32, i32) {
    %c0_i32 = arith.constant 0 : i32
    return %arg0, %arg1 : i32, i32
  }
}

</mosaic_0001>

<bundles_post_ra>
// kernel: tpu_custom_call.1
= control target key start
LH: loop header
LB: loop body
LE: loop exit
PB: predicated region body
PF: predicated region fallthrough
CT: control target
= control target key end

     0   :  { %6 = vsyncpa [#allocation3], 0  ;;  %s124_s0 = inlined_call_operand.hbm [shape: f32[8,16], index: 0, kind: input, shape index: {}]   ;;  %s125_s1 = inlined_call_operand.hbm [shape: f32[8,13], index: 1, kind: output, shape index: {}]  }
   0x1   :  { %7 = vsyncpa [#allocation4], 0  ;;  %s88_s6 = smov [#allocation2]   ;;  %s40_s10 = scalar_lea.hbm %s124_s0, 128 }
   0x2   :  { %s14_s7 = sshll.u32 %s88_s6, 4  ;;  %p41_p0 = scmp.ne.s32.totalorder %s124_s0, %s40_s10  ;;  %s15_s7 = int_to_ptr.vmem [resolvable:$true] %s14_s7 }
   0x3   :  { %p44_p1 = scmp.lt.u32.totalorder %s40_s10, %s124_s0 }
   0x5   :  { %p46_p2 = pnand %p44_p1, %p41_p0 }
   0x7   :  { %49 = shalt.err (!%p46_p2)
}
   0x8   :  { %s50_s15 = scalar_lea.vmem %s15_s7, 128  ;;  %p55_p4 = scmp.lt.s32.totalorder %s15_s7, %s15_s7 }
   0x9   :  { %p51_p3 = scmp.ne.s32.totalorder %s15_s7, %s50_s15  ;;  %p56_p5 = scmp.lt.s32.totalorder %s50_s15, %s50_s15 }
   0xb   :  { %p57_p6 = por %p56_p5, %p55_p4 }
   0xd   :  { %p58_p7 = pnand %p57_p6, %p51_p3 }
   0xf   :  { %61 = shalt.err (!%p58_p7)
}
  0x10   :  { %17 = dma.hbm_to_vmem [thread:$0]  %s124_s0, 128, %s15_s7, [#allocation3]  }
  0x11   :  { %84 = dma.done.wait [#allocation3], 128  }
  0x12   :  { %85 = vsyncadd [#allocation3], 4294967168  ;;  %s89_s18 = smov [#allocation5]   ;;  %v21_v0 = vld [vmem:[#allocation2] sm:$0xff] }
  0x13   :  { %s29_s19 = sshll.u32 %s89_s18, 4  ;;  %22 = vst [vmem:[#allocation5] sm:$0xff] %v21_v0  ;;  %s30_s19 = int_to_ptr.vmem [resolvable:$true] %s29_s19 }
  0x14   :  { %s62_s20 = scalar_lea.vmem %s30_s19, 128  ;;  %p67_p9 = scmp.lt.s32.totalorder %s30_s19, %s30_s19 }
  0x15   :  { %p63_p8 = scmp.ne.s32.totalorder %s30_s19, %s62_s20  ;;  %p68_p10 = scmp.lt.s32.totalorder %s62_s20, %s62_s20 }
  0x17   :  { %p69_p11 = por %p68_p10, %p67_p9 }
  0x19   :  { %p70_p12 = pnand %p69_p11, %p63_p8 }
  0x1b   :  { %73 = shalt.err (!%p70_p12)
}
  0x1c   :  { %s74_s23 = scalar_lea.hbm %s125_s1, 128 }
  0x1d   :  { %p75_p13 = scmp.ne.s32.totalorder %s125_s1, %s74_s23  ;;  %p78_p0 = scmp.lt.u32.totalorder %s74_s23, %s125_s1 }
  0x1f   :  { %p80_p1 = pnand %p78_p0, %p75_p13 }
  0x21   :  { %83 = shalt.err (!%p80_p1)
}
  0x22   :  { %32 = dma.vmem_to_hbm [thread:$0]  %s30_s19, 128, %s125_s1, [#allocation4]  }
  0x23   :  { %86 = dma.done.wait [#allocation4], 128  }
  0x24   :  { %87 = vsyncadd [#allocation4], 4294967168 }
  0x25   :  { %36 = vsyncpa [#allocation3], 1 }
  0x26   :  { %37 = vsyncpa [#allocation4], 1 }

</bundles_post_ra>
